<compile_context>
chip_gen: v6e
topology: v6e:2x2x1
jax: 0.10.0
libtpu: 0.0.40
codegen_flags: <defaults>
</compile_context>

<pallas_src>
import math

import jax
import jax.numpy as jnp
from jax import lax
from jax.experimental import pallas as pl
from jax.experimental.pallas import tpu as pltpu


# ----------------------------- kernel 1: projections -------------------------
def _mla_proj_kernel(x_ref, wdq_ref, wuq_ref, qg_ref, qb_ref,
                     wdkv_ref, wuk_ref, wuv_ref, kvg_ref, kvb_ref,
                     q_ref, k_ref, v_ref, *, eps: float = 1e-5):
    f32 = jnp.float32
    x = x_ref[0]                       # (bq, C); keep input dtype for the MXU
    cdt = x.dtype

    def layernorm(h, g, b):            # h is the f32 matmul accumulator
        mu = jnp.mean(h, axis=-1, keepdims=True)
        c = h - mu
        var = jnp.mean(c * c, axis=-1, keepdims=True)   # two-pass, stable
        return c * lax.rsqrt(var + eps) * g + b

    # Q path: down-proj -> LN -> up-proj (W_uq already carries 1/sqrt(dh)).
    cq = jnp.dot(x, wdq_ref[...], preferred_element_type=f32)
    cq = layernorm(cq, qg_ref[...], qb_ref[...]).astype(cdt)
    q_ref[0] = jnp.dot(cq, wuq_ref[...],
                       preferred_element_type=f32).astype(q_ref.dtype)

    # KV path: down-proj -> LN -> split up-proj (K and V as separate matmuls).
    ckv = jnp.dot(x, wdkv_ref[...], preferred_element_type=f32)
    ckv = layernorm(ckv, kvg_ref[...], kvb_ref[...]).astype(cdt)
    k_ref[0] = jnp.dot(ckv, wuk_ref[...],
                       preferred_element_type=f32).astype(k_ref.dtype)
    v_ref[0] = jnp.dot(ckv, wuv_ref[...],
                       preferred_element_type=f32).astype(v_ref.dtype)


# ------------------- kernel 2: flash attention + output proj -----------------
def _mla_attn_kernel(qi_map_ref, kj_map_ref,          # scalar prefetch (SMEM)
                     q_ref, k_ref, v_ref, wo_ref,     # inputs (VMEM)
                     o_ref,                           # output (VMEM)
                     m_sc, l_sc, acc_sc):             # scratch
    f32 = jnp.float32
    step = pl.program_id(1)
    qi = qi_map_ref[step]
    kj = kj_map_ref[step]

    @pl.when(kj == 0)
    def _init():
        m_sc[...] = jnp.full(m_sc.shape, -jnp.inf, f32)
        l_sc[...] = jnp.zeros(l_sc.shape, f32)
        acc_sc[...] = jnp.zeros(acc_sc.shape, f32)

    def _online_update(apply_causal_mask):
        q = q_ref[0]                   # (H, bq, dh); softmax scale pre-folded
        k = k_ref[0]                   # (H, bk, dh)
        v = v_ref[0]
        s = jnp.einsum("hqd,hkd->hqk", q, k, preferred_element_type=f32)
        if apply_causal_mask:          # only the diagonal tile needs the mask
            bq, bk = s.shape[1], s.shape[2]
            row = lax.broadcasted_iota(jnp.int32, (bq, bk), 0)
            col = lax.broadcasted_iota(jnp.int32, (bq, bk), 1)
            s = jnp.where((col <= row)[None, :, :], s, -jnp.inf)
        m_prev = m_sc[...]
        m_new = jnp.maximum(m_prev, jnp.max(s, axis=-1, keepdims=True))
        alpha = jnp.exp(m_prev - m_new)
        p = jnp.exp(s - m_new)
        l_sc[...] = alpha * l_sc[...] + jnp.sum(p, axis=-1, keepdims=True)
        acc_sc[...] = alpha * acc_sc[...] + jnp.einsum(
            "hqk,hkd->hqd", p.astype(v.dtype), v, preferred_element_type=f32)
        m_sc[...] = m_new

    @pl.when(kj < qi)                  # fully-unmasked kv tile: no mask at all
    def _below_diag():
        _online_update(False)

    @pl.when(kj == qi)                 # diagonal tile: mask, then finalize
    def _diag_and_finalize():
        _online_update(True)
        # Exact reciprocal: runs once per (b, qi) tile, precision > speed.
        o = acc_sc[...] / l_sc[...]                        # (H, bq, dh) f32
        cdt = q_ref.dtype
        # Fused output projection: one batched MXU einsum over heads + one
        # vectorized reduce (no unrolled per-head matmul/add chain, no vreg
        # pressure from a running accumulator across an unrolled loop).
        contrib = jnp.einsum("hqd,hdc->hqc", o.astype(cdt), wo_ref[...],
                             preferred_element_type=f32)
        o_ref[0] = jnp.sum(contrib, axis=0).astype(o_ref.dtype)
        # kv tiles with kj > qi never exist as grid steps (triangular grid);
        # the output block written here is flushed when (b, qi) changes.


# ----------------------------------- wrapper ---------------------------------
def mla_forward(x, params, *, n_heads, block_q=None):
    """x: (B, T, d_model). Returns (out, (K_heads, V_heads)) like the torch module."""
    # TODO(synk): KV-cache path (KV is not None / prev_seq_length > 0) is not
    # implemented; this matches the module's forward with KV=None.
    B, T, C = x.shape
    assert C % n_heads == 0
    dh = C // n_heads
    q_proj = C // 2
    kv_proj = 2 * C // 3

    W_dq, W_uq, q_gamma, q_beta, W_dkv, W_ukv, kv_gamma, kv_beta, W_o = params

    # ---- wrapper-side layout / constant folding (one-time, off the hot path)
    # Fold the 1/sqrt(dh) softmax scale into the Q up-projection so the
    # attention inner loop never rescales Q.
    W_uq_scaled = W_uq * jnp.asarray(1.0 / math.sqrt(dh), W_uq.dtype)
    W_uk = W_ukv[:, :C]
    W_uv = W_ukv[:, C:]
    wo_r = W_o.T.reshape(n_heads, dh, C)     # W_o^T rows grouped per head
    q_gamma = q_gamma.reshape(1, q_proj)
    q_beta = q_beta.reshape(1, q_proj)
    kv_gamma = kv_gamma.reshape(1, 2 * kv_proj)
    kv_beta = kv_beta.reshape(1, 2 * kv_proj)

    # One block size drives both the q and kv tiles (the causal mask and the
    # diagonal/finalize logic assume block_q == block_kv).  256 is a good
    # default on v6e/v7x (matches the 256-wide MXU); v5e can go 256-512 since
    # the kv inner loop is HBM-bound there and VMEM is 128 MiB.
    bq = block_q if block_q is not None else min(T, 256)
    assert T % bq == 0 and (bq == T or bq % 8 == 0)
    n_q = T // bq

    def const_spec(shape):
        # NOTE(perf/v7x): at production d_model the resident weights must not
        # be double-buffered (W_o alone is ~C^2*2B in bf16); either request
        # single-buffering for these constant blocks or tile the up/down
        # projection weights over an extra grid axis with a pl.when-initialized
        # f32 accumulator.  Left resident here for the small self-test shapes.
        return pl.BlockSpec(shape, lambda b, i: (0, 0))

    seq_block = pl.BlockSpec((1, bq, C), lambda b, i: (b, i, 0))

    # ---- stage 1: Q / K / V projections ----
    Q, K, V = pl.pallas_call(
        _mla_proj_kernel,
        out_shape=(jax.ShapeDtypeStruct((B, T, C), x.dtype),) * 3,
        grid_spec=pltpu.PrefetchScalarGridSpec(
            num_scalar_prefetch=0,
            grid=(B, n_q),
            in_specs=[
                seq_block,
                const_spec(W_dq.shape), const_spec(W_uq_scaled.shape),
                const_spec(q_gamma.shape), const_spec(q_beta.shape),
                const_spec(W_dkv.shape), const_spec(W_uk.shape),
                const_spec(W_uv.shape),
                const_spec(kv_gamma.shape), const_spec(kv_beta.shape),
            ],
            out_specs=[seq_block, seq_block, seq_block],
        ),
        compiler_params=pltpu.CompilerParams(
            dimension_semantics=("parallel", "parallel"),
            vmem_limit_bytes=48 * 1024 * 1024),
    )(x, W_dq, W_uq_scaled, q_gamma, q_beta,
      W_dkv, W_uk, W_uv, kv_gamma, kv_beta)

    # Head-major layout.  K/V need this transpose anyway for the module's
    # return value; Q pays one extra XLA transpose so the attention kernel
    # sees clean leading-batch head tiles (no in-kernel relayout).
    # TODO(synk): when dh == 128 write these head-major directly from kernel 1
    # (lane-dense store) and drop the three XLA reshape/transpose passes.
    Qh = Q.reshape(B, T, n_heads, dh).transpose(0, 2, 1, 3)
    Kh = K.reshape(B, T, n_heads, dh).transpose(0, 2, 1, 3)
    Vh = V.reshape(B, T, n_heads, dh).transpose(0, 2, 1, 3)

    # ---- stage 2: causal flash attention + fused output projection ----
    # Flatten (qi, kj) into a single lower-triangular step axis: fully-masked
    # kj > qi tiles never become grid steps at all.  The step -> (qi, kj)
    # mapping is scalar-prefetched into SMEM and consumed by every index_map.
    qi_list, kj_list = [], []
    for i in range(n_q):
        for j in range(i + 1):
            qi_list.append(i)
            kj_list.append(j)
    n_steps = len(qi_list)
    qi_of_step = jnp.asarray(qi_list, jnp.int32)
    kj_of_step = jnp.asarray(kj_list, jnp.int32)

    q_spec = pl.BlockSpec((1, n_heads, bq, dh),
                          lambda b, s, qi_m, kj_m: (b, 0, qi_m[s], 0))
    kv_spec = pl.BlockSpec((1, n_heads, bq, dh),
                           lambda b, s, qi_m, kj_m: (b, 0, kj_m[s], 0))
    wo_spec = pl.BlockSpec((n_heads, dh, C),
                           lambda b, s, qi_m, kj_m: (0, 0, 0))
    out_spec = pl.BlockSpec((1, bq, C),
                            lambda b, s, qi_m, kj_m: (b, qi_m[s], 0))

    out = pl.pallas_call(
        _mla_attn_kernel,
        out_shape=jax.ShapeDtypeStruct((B, T, C), x.dtype),
        grid_spec=pltpu.PrefetchScalarGridSpec(
            num_scalar_prefetch=2,
            grid=(B, n_steps),
            in_specs=[q_spec, kv_spec, kv_spec, wo_spec],
            out_specs=out_spec,
            scratch_shapes=[
                pltpu.VMEM((n_heads, bq, 1), jnp.float32),   # m (running max)
                pltpu.VMEM((n_heads, bq, 1), jnp.float32),   # l (running denom)
                pltpu.VMEM((n_heads, bq, dh), jnp.float32),  # acc
            ],
        ),
        compiler_params=pltpu.CompilerParams(
            # Batch axis feeds both TensorCores on v7x; the flattened step
            # axis carries the online-softmax accumulation -> "arbitrary".
            dimension_semantics=("parallel", "arbitrary"),
            vmem_limit_bytes=48 * 1024 * 1024),
    )(qi_of_step, kj_of_step, Qh, Kh, Vh, wo_r)

    return out, (Kh, Vh)


# -------------------------------- reference ----------------------------------
def _reference(x, params, n_heads):
    """Pure-JAX reference matching the PyTorch forward (KV=None, prev_seq_length=0)."""
    W_dq, W_uq, q_gamma, q_beta, W_dkv, W_ukv, kv_gamma, kv_beta, W_o = params
    B, T, C = x.shape
    dh = C // n_heads

    def ln(v, g, b):
        mu = jnp.mean(v, -1, keepdims=True)
        var = jnp.mean((v - mu) ** 2, -1, keepdims=True)
        return (v - mu) / jnp.sqrt(var + 1e-5) * g + b

    Q = ln(x @ W_dq, q_gamma, q_beta) @ W_uq
    kv = ln(x @ W_dkv, kv_gamma, kv_beta) @ W_ukv
    K, V = kv[..., :C], kv[..., C:]
    Qh = Q.reshape(B, T, n_heads, dh).transpose(0, 2, 1, 3)
    Kh = K.reshape(B, T, n_heads, dh).transpose(0, 2, 1, 3)
    Vh = V.reshape(B, T, n_heads, dh).transpose(0, 2, 1, 3)
    s = jnp.einsum("bhqd,bhkd->bhqk", Qh, Kh) / math.sqrt(dh)
    mask = jnp.tril(jnp.ones((T, T), bool))
    s = jnp.where(mask, s, -jnp.inf)
    p = jax.nn.softmax(s, axis=-1)
    o = jnp.einsum("bhqk,bhkd->bhqd", p, Vh)
    o = o.transpose(0, 2, 1, 3).reshape(B, T, C)
    return o @ W_o.T, (Kh, Vh)


if __name__ == "__main__":
    # Small config consistent with the module: d_model divisible by n_heads,
    # by 2 (q_proj) and by 3 (kv_proj).  T=16 with block_q=8 exercises the
    # triangular-grid step mapping (diagonal and below-diagonal tiles).
    B, T, d_model, n_heads = 2, 16, 48, 4
    q_proj = d_model // 2
    kv_proj = 2 * d_model // 3

    key = jax.random.PRNGKey(0)
    ks = jax.random.split(key, 6)
    W_dq = 0.01 * jax.random.normal(ks[0], (d_model, q_proj), jnp.float32)
    W_uq = 0.01 * jax.random.normal(ks[1], (q_proj, d_model), jnp.float32)
    W_dkv = 0.01 * jax.random.normal(ks[2], (d_model, 2 * kv_proj), jnp.float32)
    W_ukv = 0.01 * jax.random.normal(ks[3], (2 * kv_proj, 2 * d_model), jnp.float32)
    W_o = 0.01 * jax.random.normal(ks[4], (d_model, d_model), jnp.float32)
    q_gamma = jnp.ones((q_proj,), jnp.float32)       # nn.LayerNorm default init
    q_beta = jnp.zeros((q_proj,), jnp.float32)
    kv_gamma = jnp.ones((2 * kv_proj,), jnp.float32)
    kv_beta = jnp.zeros((2 * kv_proj,), jnp.float32)
    params = (W_dq, W_uq, q_gamma, q_beta, W_dkv, W_ukv, kv_gamma, kv_beta, W_o)

    x = jax.random.normal(ks[5], (B, T, d_model), jnp.float32)

    out, (K_heads, V_heads) = mla_forward(x, params, n_heads=n_heads, block_q=8)
    jax.block_until_ready((out, K_heads, V_heads))

    ref_out, (ref_K, ref_V) = _reference(x, params, n_heads)
    assert jnp.allclose(out, ref_out, atol=1e-4, rtol=1e-4)
    assert jnp.allclose(K_heads, ref_K, atol=1e-4, rtol=1e-4)
    assert jnp.allclose(V_heads, ref_V, atol=1e-4, rtol=1e-4)

    print("KERNEL_OK")
</pallas_src>

<mosaic_0001>
module attributes {stable_mosaic.version = 11 : i64} {
  func.func @_mla_proj_kernel(%arg0: i32, %arg1: i32, %arg2: memref<1x8x48xf32, #tpu.memory_space<vmem>>, %arg3: memref<48x24xf32, #tpu.memory_space<vmem>>, %arg4: memref<24x48xf32, #tpu.memory_space<vmem>>, %arg5: memref<1x24xf32, #tpu.memory_space<vmem>>, %arg6: memref<1x24xf32, #tpu.memory_space<vmem>>, %arg7: memref<48x64xf32, #tpu.memory_space<vmem>>, %arg8: memref<64x48xf32, #tpu.memory_space<vmem>>, %arg9: memref<64x48xf32, #tpu.memory_space<vmem>>, %arg10: memref<1x64xf32, #tpu.memory_space<vmem>>, %arg11: memref<1x64xf32, #tpu.memory_space<vmem>>, %arg12: memref<1x8x48xf32, #tpu.memory_space<vmem>>, %arg13: memref<1x8x48xf32, #tpu.memory_space<vmem>>, %arg14: memref<1x8x48xf32, #tpu.memory_space<vmem>>) attributes {dimension_semantics = [#tpu.dimension_semantics<parallel>, #tpu.dimension_semantics<parallel>], iteration_bounds = array<i64: 2, 2>, scalar_prefetch = 0 : i64, scratch_operands = 0 : i64, tpu.core_type = #tpu.core_type<tc>, window_params = [{transform_indices = @transform_0, window_bounds = array<i64: 1, 8, 48>}, {pipeline_mode = #tpu.pipeline_mode<synchronous>, transform_indices = @transform_1, window_bounds = array<i64: 48, 24>}, {pipeline_mode = #tpu.pipeline_mode<synchronous>, transform_indices = @transform_2, window_bounds = array<i64: 24, 48>}, {pipeline_mode = #tpu.pipeline_mode<synchronous>, transform_indices = @transform_3, window_bounds = array<i64: 1, 24>}, {pipeline_mode = #tpu.pipeline_mode<synchronous>, transform_indices = @transform_4, window_bounds = array<i64: 1, 24>}, {pipeline_mode = #tpu.pipeline_mode<synchronous>, transform_indices = @transform_5, window_bounds = array<i64: 48, 64>}, {pipeline_mode = #tpu.pipeline_mode<synchronous>, transform_indices = @transform_6, window_bounds = array<i64: 64, 48>}, {pipeline_mode = #tpu.pipeline_mode<synchronous>, transform_indices = @transform_7, window_bounds = array<i64: 64, 48>}, {pipeline_mode = #tpu.pipeline_mode<synchronous>, transform_indices = @transform_8, window_bounds = array<i64: 1, 64>}, {pipeline_mode = #tpu.pipeline_mode<synchronous>, transform_indices = @transform_9, window_bounds = array<i64: 1, 64>}, {transform_indices = @transform_10, window_bounds = array<i64: 1, 8, 48>}, {transform_indices = @transform_11, window_bounds = array<i64: 1, 8, 48>}, {transform_indices = @transform_12, window_bounds = array<i64: 1, 8, 48>}]} {
    %c0 = arith.constant 0 : index
    %c0_0 = arith.constant 0 : index
    %c0_1 = arith.constant 0 : index
    %0 = vector.load %arg2[%c0, %c0_0, %c0_1] : memref<1x8x48xf32, #tpu.memory_space<vmem>>, vector<1x8x48xf32>
    %1 = vector.shape_cast %0 : vector<1x8x48xf32> to vector<8x48xf32>
    %c0_2 = arith.constant 0 : index
    %c0_3 = arith.constant 0 : index
    %2 = vector.load %arg3[%c0_2, %c0_3] : memref<48x24xf32, #tpu.memory_space<vmem>>, vector<48x24xf32>
    %cst = arith.constant dense<0.000000e+00> : vector<8x24xf32>
    %3 = tpu.matmul %1, %2, %cst {dimension_numbers = #tpu.dot_dimension_numbers<[1], [0], [0], [1], [0, 0, 1, 1], [], []>} : vector<8x48xf32>, vector<48x24xf32>, vector<8x24xf32> -> vector<8x24xf32>
    %c0_4 = arith.constant 0 : index
    %c0_5 = arith.constant 0 : index
    %4 = vector.load %arg5[%c0_4, %c0_5] : memref<1x24xf32, #tpu.memory_space<vmem>>, vector<1x24xf32>
    %c0_6 = arith.constant 0 : index
    %c0_7 = arith.constant 0 : index
    %5 = vector.load %arg6[%c0_6, %c0_7] : memref<1x24xf32, #tpu.memory_space<vmem>>, vector<1x24xf32>
    %cst_8 = arith.constant dense<0.000000e+00> : vector<8xf32>
    %6 = vector.multi_reduction <add>, %3, %cst_8 [1] : vector<8x24xf32> to vector<8xf32>
    %7 = vector.shape_cast %6 : vector<8xf32> to vector<8x1xf32>
    %cst_9 = arith.constant 2.400000e+01 : f32
    %8 = vector.broadcast %cst_9 : f32 to vector<8x1xf32>
    %9 = arith.divf %7, %8 : vector<8x1xf32>
    %10 = vector.broadcast %9 : vector<8x1xf32> to vector<8x24xf32>
    %11 = arith.subf %3, %10 : vector<8x24xf32>
    %12 = arith.mulf %11, %11 : vector<8x24xf32>
    %cst_10 = arith.constant dense<0.000000e+00> : vector<8xf32>
    %13 = vector.multi_reduction <add>, %12, %cst_10 [1] : vector<8x24xf32> to vector<8xf32>
    %14 = vector.shape_cast %13 : vector<8xf32> to vector<8x1xf32>
    %cst_11 = arith.constant 2.400000e+01 : f32
    %15 = vector.broadcast %cst_11 : f32 to vector<8x1xf32>
    %16 = arith.divf %14, %15 : vector<8x1xf32>
    %cst_12 = arith.constant 9.99999974E-6 : f32
    %17 = vector.broadcast %cst_12 : f32 to vector<8x1xf32>
    %18 = arith.addf %16, %17 : vector<8x1xf32>
    %19 = math.rsqrt %18 : vector<8x1xf32>
    %20 = vector.broadcast %19 : vector<8x1xf32> to vector<8x24xf32>
    %21 = arith.mulf %11, %20 : vector<8x24xf32>
    %22 = vector.broadcast %4 : vector<1x24xf32> to vector<8x24xf32>
    %23 = arith.mulf %21, %22 : vector<8x24xf32>
    %24 = vector.broadcast %5 : vector<1x24xf32> to vector<8x24xf32>
    %25 = arith.addf %23, %24 : vector<8x24xf32>
    %c0_13 = arith.constant 0 : index
    %c0_14 = arith.constant 0 : index
    %26 = vector.load %arg4[%c0_13, %c0_14] : memref<24x48xf32, #tpu.memory_space<vmem>>, vector<24x48xf32>
    %cst_15 = arith.constant dense<0.000000e+00> : vector<8x48xf32>
    %27 = tpu.matmul %25, %26, %cst_15 {dimension_numbers = #tpu.dot_dimension_numbers<[1], [0], [0], [1], [0, 0, 1, 1], [], []>} : vector<8x24xf32>, vector<24x48xf32>, vector<8x48xf32> -> vector<8x48xf32>
    %c0_16 = arith.constant 0 : index
    %c0_17 = arith.constant 0 : index
    %c0_18 = arith.constant 0 : index
    %28 = vector.load %arg12[%c0_16, %c0_17, %c0_18] : memref<1x8x48xf32, #tpu.memory_space<vmem>>, vector<1x8x48xf32>
    %29 = vector.shape_cast %28 : vector<1x8x48xf32> to vector<8x48xf32>
    %30 = vector.shape_cast %27 : vector<8x48xf32> to vector<1x8x48xf32>
    tpu.vector_store %arg12[%c0_16, %c0_17, %c0_18], %30 {strides = array<i32>} : memref<1x8x48xf32, #tpu.memory_space<vmem>>, vector<1x8x48xf32>,
    %c0_19 = arith.constant 0 : index
    %c0_20 = arith.constant 0 : index
    %31 = vector.load %arg7[%c0_19, %c0_20] : memref<48x64xf32, #tpu.memory_space<vmem>>, vector<48x64xf32>
    %cst_21 = arith.constant dense<0.000000e+00> : vector<8x64xf32>
    %32 = tpu.matmul %1, %31, %cst_21 {dimension_numbers = #tpu.dot_dimension_numbers<[1], [0], [0], [1], [0, 0, 1, 1], [], []>} : vector<8x48xf32>, vector<48x64xf32>, vector<8x64xf32> -> vector<8x64xf32>
    %c0_22 = arith.constant 0 : index
    %c0_23 = arith.constant 0 : index
    %33 = vector.load %arg10[%c0_22, %c0_23] : memref<1x64xf32, #tpu.memory_space<vmem>>, vector<1x64xf32>
    %c0_24 = arith.constant 0 : index
    %c0_25 = arith.constant 0 : index
    %34 = vector.load %arg11[%c0_24, %c0_25] : memref<1x64xf32, #tpu.memory_space<vmem>>, vector<1x64xf32>
    %cst_26 = arith.constant dense<0.000000e+00> : vector<8xf32>
    %35 = vector.multi_reduction <add>, %32, %cst_26 [1] : vector<8x64xf32> to vector<8xf32>
    %36 = vector.shape_cast %35 : vector<8xf32> to vector<8x1xf32>
    %cst_27 = arith.constant 6.400000e+01 : f32
    %37 = vector.broadcast %cst_27 : f32 to vector<8x1xf32>
    %38 = arith.divf %36, %37 : vector<8x1xf32>
    %39 = vector.broadcast %38 : vector<8x1xf32> to vector<8x64xf32>
    %40 = arith.subf %32, %39 : vector<8x64xf32>
    %41 = arith.mulf %40, %40 : vector<8x64xf32>
    %cst_28 = arith.constant dense<0.000000e+00> : vector<8xf32>
    %42 = vector.multi_reduction <add>, %41, %cst_28 [1] : vector<8x64xf32> to vector<8xf32>
    %43 = vector.shape_cast %42 : vector<8xf32> to vector<8x1xf32>
    %cst_29 = arith.constant 6.400000e+01 : f32
    %44 = vector.broadcast %cst_29 : f32 to vector<8x1xf32>
    %45 = arith.divf %43, %44 : vector<8x1xf32>
    %cst_30 = arith.constant 9.99999974E-6 : f32
    %46 = vector.broadcast %cst_30 : f32 to vector<8x1xf32>
    %47 = arith.addf %45, %46 : vector<8x1xf32>
    %48 = math.rsqrt %47 : vector<8x1xf32>
    %49 = vector.broadcast %48 : vector<8x1xf32> to vector<8x64xf32>
    %50 = arith.mulf %40, %49 : vector<8x64xf32>
    %51 = vector.broadcast %33 : vector<1x64xf32> to vector<8x64xf32>
    %52 = arith.mulf %50, %51 : vector<8x64xf32>
    %53 = vector.broadcast %34 : vector<1x64xf32> to vector<8x64xf32>
    %54 = arith.addf %52, %53 : vector<8x64xf32>
    %c0_31 = arith.constant 0 : index
    %c0_32 = arith.constant 0 : index
    %55 = vector.load %arg8[%c0_31, %c0_32] : memref<64x48xf32, #tpu.memory_space<vmem>>, vector<64x48xf32>
    %cst_33 = arith.constant dense<0.000000e+00> : vector<8x48xf32>
    %56 = tpu.matmul %54, %55, %cst_33 {dimension_numbers = #tpu.dot_dimension_numbers<[1], [0], [0], [1], [0, 0, 1, 1], [], []>} : vector<8x64xf32>, vector<64x48xf32>, vector<8x48xf32> -> vector<8x48xf32>
    %c0_34 = arith.constant 0 : index
    %c0_35 = arith.constant 0 : index
    %c0_36 = arith.constant 0 : index
    %57 = vector.load %arg13[%c0_34, %c0_35, %c0_36] : memref<1x8x48xf32, #tpu.memory_space<vmem>>, vector<1x8x48xf32>
    %58 = vector.shape_cast %57 : vector<1x8x48xf32> to vector<8x48xf32>
    %59 = vector.shape_cast %56 : vector<8x48xf32> to vector<1x8x48xf32>
    tpu.vector_store %arg13[%c0_34, %c0_35, %c0_36], %59 {strides = array<i32>} : memref<1x8x48xf32, #tpu.memory_space<vmem>>, vector<1x8x48xf32>,
    %c0_37 = arith.constant 0 : index
    %c0_38 = arith.constant 0 : index
    %60 = vector.load %arg9[%c0_37, %c0_38] : memref<64x48xf32, #tpu.memory_space<vmem>>, vector<64x48xf32>
    %cst_39 = arith.constant dense<0.000000e+00> : vector<8x48xf32>
    %61 = tpu.matmul %54, %60, %cst_39 {dimension_numbers = #tpu.dot_dimension_numbers<[1], [0], [0], [1], [0, 0, 1, 1], [], []>} : vector<8x64xf32>, vector<64x48xf32>, vector<8x48xf32> -> vector<8x48xf32>
    %c0_40 = arith.constant 0 : index
    %c0_41 = arith.constant 0 : index
    %c0_42 = arith.constant 0 : index
    %62 = vector.load %arg14[%c0_40, %c0_41, %c0_42] : memref<1x8x48xf32, #tpu.memory_space<vmem>>, vector<1x8x48xf32>
    %63 = vector.shape_cast %62 : vector<1x8x48xf32> to vector<8x48xf32>
    %64 = vector.shape_cast %61 : vector<8x48xf32> to vector<1x8x48xf32>
    tpu.vector_store %arg14[%c0_40, %c0_41, %c0_42], %64 {strides = array<i32>} : memref<1x8x48xf32, #tpu.memory_space<vmem>>, vector<1x8x48xf32>,
    return
  }
  func.func @transform_0(%arg0: i32, %arg1: i32) -> (i32, i32, i32) {
    %c0_i32 = arith.constant 0 : i32
    %c0_i32_0 = arith.constant 0 : i32
    return %arg0, %arg1, %c0_i32 : i32, i32, i32
  }
  func.func @transform_1(%arg0: i32, %arg1: i32) -> (i32, i32) {
    %c0_i32 = arith.constant 0 : i32
    %c0_i32_0 = arith.constant 0 : i32
    %c0_i32_1 = arith.constant 0 : i32
    return %c0_i32, %c0_i32_0 : i32, i32
  }
  func.func @transform_2(%arg0: i32, %arg1: i32) -> (i32, i32) {
    %c0_i32 = arith.constant 0 : i32
    %c0_i32_0 = arith.constant 0 : i32
    %c0_i32_1 = arith.constant 0 : i32
    return %c0_i32, %c0_i32_0 : i32, i32
  }
  func.func @transform_3(%arg0: i32, %arg1: i32) -> (i32, i32) {
    %c0_i32 = arith.constant 0 : i32
    %c0_i32_0 = arith.constant 0 : i32
    %c0_i32_1 = arith.constant 0 : i32
    return %c0_i32, %c0_i32_0 : i32, i32
  }
  func.func @transform_4(%arg0: i32, %arg1: i32) -> (i32, i32) {
    %c0_i32 = arith.constant 0 : i32
    %c0_i32_0 = arith.constant 0 : i32
    %c0_i32_1 = arith.constant 0 : i32
    return %c0_i32, %c0_i32_0 : i32, i32
  }
  func.func @transform_5(%arg0: i32, %arg1: i32) -> (i32, i32) {
    %c0_i32 = arith.constant 0 : i32
    %c0_i32_0 = arith.constant 0 : i32
    %c0_i32_1 = arith.constant 0 : i32
    return %c0_i32, %c0_i32_0 : i32, i32
  }
  func.func @transform_6(%arg0: i32, %arg1: i32) -> (i32, i32) {
    %c0_i32 = arith.constant 0 : i32
    %c0_i32_0 = arith.constant 0 : i32
    %c0_i32_1 = arith.constant 0 : i32
    return %c0_i32, %c0_i32_0 : i32, i32
  }
  func.func @transform_7(%arg0: i32, %arg1: i32) -> (i32, i32) {
    %c0_i32 = arith.constant 0 : i32
    %c0_i32_0 = arith.constant 0 : i32
    %c0_i32_1 = arith.constant 0 : i32
    return %c0_i32, %c0_i32_0 : i32, i32
  }
  func.func @transform_8(%arg0: i32, %arg1: i32) -> (i32, i32) {
    %c0_i32 = arith.constant 0 : i32
    %c0_i32_0 = arith.constant 0 : i32
    %c0_i32_1 = arith.constant 0 : i32
    return %c0_i32, %c0_i32_0 : i32, i32
  }
  func.func @transform_9(%arg0: i32, %arg1: i32) -> (i32, i32) {
    %c0_i32 = arith.constant 0 : i32
    %c0_i32_0 = arith.constant 0 : i32
    %c0_i32_1 = arith.constant 0 : i32
    return %c0_i32, %c0_i32_0 : i32, i32
  }
  func.func @transform_10(%arg0: i32, %arg1: i32) -> (i32, i32, i32) {
    %c0_i32 = arith.constant 0 : i32
    %c0_i32_0 = arith.constant 0 : i32
    return %arg0, %arg1, %c0_i32 : i32, i32, i32
  }
  func.func @transform_11(%arg0: i32, %arg1: i32) -> (i32, i32, i32) {
    %c0_i32 = arith.constant 0 : i32
    %c0_i32_0 = arith.constant 0 : i32
    return %arg0, %arg1, %c0_i32 : i32, i32, i32
  }
  func.func @transform_12(%arg0: i32, %arg1: i32) -> (i32, i32, i32) {
    %c0_i32 = arith.constant 0 : i32
    %c0_i32_0 = arith.constant 0 : i32
    return %arg0, %arg1, %c0_i32 : i32, i32, i32
  }
}

</mosaic_0001>

<bundles_post_ra>
// kernel: tpu_custom_call.1
= control target key start
LH: loop header
LB: loop body
LE: loop exit
PB: predicated region body
PF: predicated region fallthrough
CT: control target
= control target key end

     0   :  { %18 = vsyncpa [#allocation3], 0  ;;  %s1934_s0 = inlined_call_operand.vmem [shape: f32[2,16,48], index: 0, kind: input, shape index: {}]   ;;  %s1935_s1 = inlined_call_operand.vmem [shape: f32[48,24], index: 1, kind: input, shape index: {}]   ;;  %s1936_s2 = inlined_call_operand.vmem [shape: f32[24,48], index: 2, kind: input, shape index: {}]   ;;  %s1937_s3 = inlined_call_operand.vmem [shape: f32[1,24], index: 3, kind: input, shape index: {}]   ;;  %s1938_s4 = inlined_call_operand.vmem [shape: f32[1,24], index: 4, kind: input, shape index: {}]   ;;  %s1939_s5 = inlined_call_operand.vmem [shape: f32[48,64], index: 5, kind: input, shape index: {}]   ;;  %s1940_s6 = inlined_call_operand.vmem [shape: f32[64,48], index: 6, kind: input, shape index: {}]   ;;  %s1941_s7 = inlined_call_operand.vmem [shape: f32[64,48], index: 7, kind: input, shape index: {}]   ;;  %s1942_s8 = inlined_call_operand.vmem [shape: f32[1,64], index: 8, kind: input, shape index: {}]   ;;  %s1943_s9 = inlined_call_operand.vmem [shape: f32[1,64], index: 9, kind: input, shape index: {}]   ;;  %s1944_s10 = inlined_call_operand.hbm [shape: f32[2,16,48], index: 10, kind: output, shape index: {0}]   ;;  %s1945_s11 = inlined_call_operand.hbm [shape: f32[2,16,48], index: 11, kind: output, shape index: {1}]   ;;  %s1946_s12 = inlined_call_operand.hbm [shape: f32[2,16,48], index: 12, kind: output, shape index: {2}]  }
   0x1   :  { %20 = vsyncpa [#allocation3 + $0x1], 0 }
   0x2   :  { %21 = vsyncpa [#allocation5], 0 }
   0x3   :  { %23 = vsyncpa [#allocation5 + $0x1], 0  ;;  %s1565_s21 = smov 0   ;;  %s1567_s22 = smov 0  }
   0x4   :  { %s1569_s23 = smov 0   ;;  %s1571_s24 = smov 0  }
   0x5   :  { %s1573_s25 = smov 0   ;;  %s1575_s26 = smov 0  }
   0x6   :  { %s1577_s27 = smov 0   ;;  %s1579_s28 = smov 0  }
   0x7 LB: > { %1956 = sst [smem:[#allocation9_spill]] %s1465_s21  ;;  %s1947_s29 = sadd.s32 4294967295, %s1493_s28   ;;  %s1493_s28 = sphi %s1579_s28, %s29_s28   ;;  %s1489_s27 = sphi %s1577_s27, %s1975_s27   ;;  %s1485_s26 = sphi %s1575_s26, %s1974_s26   ;;  %s1481_s25 = sphi %s1573_s25, %s1973_s25   ;;  %s1477_s24 = sphi %s1571_s24, %s1972_s24   ;;  %s1473_s23 = sphi %s1569_s23, %s1971_s23   ;;  %s1469_s22 = sphi %s1567_s22, %s1977_s22   ;;  %s1465_s21 = sphi %s1565_s21, %s1976_s21  }
   0x8   : > { %1957 = sst [smem:[#allocation10_spill]] %s1473_s23  ;;  %s1950_s30 = sadd.s32 4294967294, %s1493_s28  }
   0x9   : > { %1958 = sst [smem:[#allocation11_spill]] %s1485_s26  ;;  %s38_s13 = sadd.s32 1, %s1485_s26 }
   0xa   : > { %1959 = sst [smem:[#allocation12_spill]] %s1489_s27  ;;  %p39_p0 = scmp.ge.s32.totalorder %s38_s13, 2 }
   0xb   : > { %s41_s14 = sadd.s32 1, %s1489_s27  ;;  %p277_p1 = scmp.ne.s32.totalorder %s1473_s23, %s1469_s22 }
   0xc   : > { %p278_p2 = scmp.eq.s32.totalorder %s1947_s29, 3  ;;  %s1979_s13 = smov (%p39_p0, %s38_s13), 0 }
   0xd   : > { %1960 = sst [smem:[#allocation13_spill]] %s1979_s13  ;;  %s1981_s14 = smov (!%p39_p0, %s41_s14), %s1489_s27 }
   0xe   : > { %s263_s15 = ssub.s32 %s1485_s26, %s1979_s13  ;;  %p1618_p3 = por %p278_p2, %p277_p1 }
   0xf   : > { %p43_p4 = scmp.ge.s32.totalorder %s1981_s14, 2  ;;  %p283_p5 = scmp.ne.s32.totalorder %s1469_s22, %s1465_s21 }
  0x10   : > { %p284_p6 = scmp.eq.s32.totalorder %s1950_s30, 3  ;;  %p1119_p7 = scmp.ge.s32.totalorder %s1493_s28, 1 }
  0x11   : > { %s1983_s14 = smov (%p43_p4, %s1981_s14), 0  ;;  %p396_p9 = scmp.lt.s32.totalorder %s1493_s28, 5 }
  0x12   : > { %1962 = sst [smem:[#allocation14_spill]] %s1983_s14  ;;  %p1629_p8 = por %p284_p6, %p283_p5 }
  0x13   : > { %s262_s18 = ssub.s32 %s1489_s27, %s1983_s14  ;;  %s267_s19 = sadd.s32 1, %s1473_s23 }
  0x14   : > { %s1963_s17 = scalar_select %p1629_p8, 1, 0 }
  0x15   : > { %s264_s20 = sor.u32 %s263_s15, %s262_s18  ;;  %p397_p10 = pnand %p1119_p7, %p396_p9 }
  0x16   : > { %1964 = sst [smem:[#allocation15_spill]] %s1963_s17  ;;  %p265_p11 = scmp.eq.s32.totalorder %s264_s20, 0 }
  0x17   : > { %400 = sbr.rel (%p397_p10) target bundleno = 1283 (0x503), region = 60  ;;  %p451_p12 = scmp.lt.s32.totalorder (!%p397_p10), %s1481_s25, 1 }
  0x18   : > { %s1638_s29 = scalar_select %p265_p11, %s1473_s23, %s267_s19  }
  0x19   : > { %p453_p13 = scmp.lt.s32.totalorder (!%p397_p10), %s1477_s24, 1 }
  0x1a   : > { %1965 = sst [smem:[#allocation16_spill]] %s1638_s29 }
  0x1c   : > { %v465_v0 = vld [vmem:[%s1935_s1 + $0x28] sm:$0xff]  ;;  %v1495_v1 = vmov 0.0   ;;  %v464_v2 = vld [vmem:[%s1935_s1 + $0x20] sm:$0xff]  ;;  %vm1496_vm0 = vmmov 0   ;;  %s452_s26 = scalar_select %p451_p12, %s1481_s25, 1  ;;  %v463_v3 = vld [vmem:[%s1935_s1 + $0x18] sm:$0xff] }
  0x1d   : > { %1181 = vmatprep.subr.mxu0 %v1495_v1  ;;  %1193 = vmatprep.mubr.msk.f32.mxu0 %vm1496_vm0, %v1495_v1  ;;  %s454_s18 = scalar_select %p453_p13, %s1477_s24, 1  ;;  %v462_v4 = vld [vmem:[%s1935_s1 + $0x10] sm:$0xff]  ;;  %v461_v5 = vld [vmem:[%s1935_s1 + $0x8] sm:$0xff]  ;;  %v460_v6 = vld [vmem:[%s1935_s1] sm:$0xff]  ;;  %vm466_vm1 = vcmask 392192   ;;  %vm542_vm2 = vcmask 195584  }
  0x1e   : > { %1182 = vmatpush3.msra.mxu0 %v465_v0  ;;  %1196 = vmatprep.subr.mxu1 %v1495_v1  ;;  %s1123_s30 = sshll.u32 %s452_s26, 1  ;;  %v573_v16 = vld [vmem:[%s1936_s2 + $0x10] sm:$0xff]  ;;  %v572_v17 = vld [vmem:[%s1936_s2 + $0x8] sm:$0xff]  ;;  %v571_v18 = vld [vmem:[%s1936_s2] sm:$0xff]  ;;  %vm726_vm3 = vcmask 523264  }
  0x1f   : > { %1183 = vmatprep.subr.mxu0 %v1495_v1  ;;  %1202 = vmatprep.mubr.msk.f32.mxu1 %vm1496_vm0, %v1495_v1  ;;  %s456_s20 = sadd.s32 %s1123_s30, %s454_s18  ;;  %v1126_v23 = vld [vmem:[%s1937_s3] ss:$0 sm:$0xff]  ;;  %v653_v28 = vld [vmem:[%s1939_s5 + $0x28] sm:$0xff]  ;;  %v651_v30 = vld [vmem:[%s1939_s5 + $0x18] sm:$0xff]  ;;  %s1137_s18 = sshll.u32 %s1481_s25, 1 }
  0x20   : > { %1184 = vmatpush3.msra.mxu0 %v464_v2  ;;  %s1124_s27 = sshll.u32 %s456_s20, 3  ;;  %1197 = vmatpush3.msra.mxu1 %v573_v16  ;;  %v1127_v25 = vld [vmem:[%s1938_s4] ss:$0 sm:$0xff]  ;;  %v650_v31 = vld [vmem:[%s1939_s5 + $0x10] sm:$0xff]  ;;  %v649_v32 = vld [vmem:[%s1939_s5 + $0x8] sm:$0xff]  ;;  %s434_s20 = sand.u32 1, %s1469_s22  }
  0x21   : > { %1185 = vmatprep.subr.mxu0 %v1495_v1  ;;  %s458_s17 = scalar_lea.vmem %s1934_s0, %s1124_s27  ;;  %1198 = vmatprep.subr.mxu1 %v1495_v1  ;;  %v652_v29 = vld [vmem:[%s1939_s5 + $0x20] sm:$0xff]  ;;  %s1733_s13 = sshll.u32 %s434_s20, 3  ;;  %v762_v44 = vld [vmem:[%s1940_s6 + $0x38] sm:$0xff]  ;;  %v761_v46 = vld [vmem:[%s1940_s6 + $0x30] sm:$0xff] }
  0x22   : > { %1186 = vmatpush3.msra.mxu0 %v463_v3  ;;  %v459_v7 = vld [vmem:[%s458_s17] sm:$0xff]  ;;  %1199 = vmatpush3.msra.mxu1 %v572_v17  ;;  %s436_s15 = scalar_lea.vmem [#allocation2], %s1733_s13  ;;  %v844_v45 = vld [vmem:[%s1941_s7 + $0x38] sm:$0xff]  ;;  %v843_v47 = vld [vmem:[%s1941_s7 + $0x30] sm:$0xff]  ;;  %s938_s30 = sadd.s32 %s1477_s24, %s1137_s18 }
  0x23   : > { %1187 = vmatprep.subr.mxu0 %v1495_v1  ;;  %1200 = vmatprep.subr.mxu1 %v1495_v1  ;;  %v648_v33 = vld [vmem:[%s1939_s5] sm:$0xff]  ;;  %v760_v48 = vld [vmem:[%s1940_s6 + $0x28] sm:$0xff]  ;;  %v758_v52 = vld [vmem:[%s1940_s6 + $0x18] sm:$0xff]  ;;  %s1813_s14 = sshll.u32 %s938_s30, 7  ;;  %s942_s23 = sshll.u32 %s436_s15, 4  ;;  %s943_s23 = int_to_ptr.vmem [resolvable:$true] %s942_s23 }
  0x24   : > { %1188 = vmatpush3.msra.mxu0 %v462_v4  ;;  %1201 = vmatpush3.msra.mxu1 %v571_v18  ;;  %v842_v49 = vld [vmem:[%s1941_s7 + $0x28] sm:$0xff]  ;;  %v759_v50 = vld [vmem:[%s1940_s6 + $0x20] sm:$0xff]  ;;  %v840_v53 = vld [vmem:[%s1941_s7 + $0x18] sm:$0xff]  ;;  %s940_s21 = scalar_lea.hbm %s1944_s10, %s1813_s14  ;;  %s917_s27 = scalar_lea.sflag [#allocation3], %s434_s20 }
  0x25   : > { %1189 = vmatprep.subr.mxu0 %v1495_v1  ;;  %1205 = vmatprep.subr.mxu1 %v1495_v1  ;;  %v841_v51 = vld [vmem:[%s1941_s7 + $0x20] sm:$0xff]  ;;  %v757_v54 = vld [vmem:[%s1940_s6 + $0x10] sm:$0xff]  ;;  %v756_v56 = vld [vmem:[%s1940_s6 + $0x8] sm:$0xff]  ;;  %s1345_s29 = scalar_lea.vmem %s943_s23, 128  ;;  %s1497_s17 = smov [#allocation2]  }
  0x26   : > { %1190 = vmatpush3.msra.mxu0 %v461_v5  ;;  %v839_v55 = vld [vmem:[%s1941_s7 + $0x10] sm:$0xff]  ;;  %v838_v57 = vld [vmem:[%s1941_s7 + $0x8] sm:$0xff]  ;;  %v755_v58 = vld [vmem:[%s1940_s6] sm:$0xff]  ;;  %p1346_p0 = scmp.ne.s32.totalorder %s943_s23, %s1345_s29  ;;  %s1349_s25 = sshll.u32 %s1497_s17, 4  ;;  %s1350_s25 = int_to_ptr.vmem [resolvable:$false] %s1349_s25 }
  0x27   : > { %1191 = vmatprep.subr.mxu0 %v1495_v1  ;;  %v837_v59 = vld [vmem:[%s1941_s7] sm:$0xff]  ;;  %s1351_s24 = scalar_lea.vmem %s1350_s25, 256  ;;  %p1352_p4 = scmp.lt.s32.totalorder %s943_s23, %s1350_s25 }
  0x28   : > { %1192 = vmatpush3.msra.mxu0 %v460_v6  ;;  %v1130_v0 = vld [vmem:[%s1942_s8] ss:$0 sm:$0xff]  ;;  %p1347_p1 = pnand %p1346_p0, %p1618_p3  ;;  %p1353_p5 = scmp.lt.s32.totalorder %s1351_s24, %s1345_s29 }
  0x29   : > { %1194 = vmatmul.mubr.msk.f32.vlgmr.msra.gmra.mxu0 %vm466_vm1, %v459_v7  ;;  %1220 = vmatprep.subr.mxu0 %v1495_v1 }
  0x2a   : > { %1236 = vmatprep.mubr.msk.f32.mxu0 %vm1496_vm0, %v1495_v1  ;;  %1221 = vmatpush3.msra.mxu0 %v762_v44  ;;  %p1348_p2 = pneg %p1347_p1  ;;  %p1354_p6 = por %p1353_p5, %p1352_p4 }
  0x2b   : > { %1222 = vmatprep.subr.mxu0 %v1495_v1 }
  0x2c   : > { %1223 = vmatpush3.msra.mxu0 %v761_v46  ;;  %p1355_p7 = pnand %p1354_p6, %p1348_p2 }
  0x2d   : > { %1224 = vmatprep.subr.mxu0 %v1495_v1 }
  0x2e   : > { %1225 = vmatpush3.msra.mxu0 %v760_v48 }
  0x2f   : > { %1226 = vmatprep.subr.mxu0 %v1495_v1 }
  0x30   : > { %1227 = vmatpush3.msra.mxu0 %v759_v50 }
  0x31   : > { %1228 = vmatprep.subr.mxu0 %v1495_v1 }
  0x32   : > { %1229 = vmatpush3.msra.mxu0 %v758_v52 }
  0x33   : > { %1230 = vmatprep.subr.mxu0 %v1495_v1 }
  0x34   : > { %1231 = vmatpush3.msra.mxu0 %v757_v54 }
  0x35   : > { %1232 = vmatprep.subr.mxu0 %v1495_v1 }
  0x36   : > { %1233 = vmatpush3.msra.mxu0 %v756_v56 }
  0x37   : > { %1234 = vmatprep.subr.mxu0 %v1495_v1 }
  0x38   : > { %1235 = vmatpush3.msra.mxu0 %v755_v58 }
  0xe9   : > { %v536_v8 = vpop.f32.mrf.mxu0 }
  0xea   : > { %v543_v9 = vsel %vm542_vm2, %v536_v8, 0.0 }
  0xeb   : > { %544 = vadd.xlane.f32.xlu0 %v543_v9  ;;  %v1195_v10 = vpop.f32.mrf.mxu0 }
 0x174   : > { %v545_v11 = vpop.xlane.xlu0 %544 }
 0x175   : > { %v547_v12 = vmul.f32 0.041666668, %v545_v11 }
 0x177   : > { %v548_v13 = vsub.f32 %v536_v8, %v547_v12 }
 0x179   : > { %v549_v14 = vmul.f32 %v548_v13, %v548_v13 }
 0x17b   : > { %v550_v15 = vsel %vm542_vm2, %v549_v14, 0.0 }
 0x17c   : > { %551 = vadd.xlane.f32.xlu0 %v550_v15 }
 0x205   : > { %v552_v19 = vpop.xlane.xlu0 %551 }
 0x206   : > { %v553_v20 = vmul.f32 0.041666668, %v552_v19 }
 0x208   : > { %v554_v21 = vadd.f32 1e-05, %v553_v20 }
 0x20a   : > { %1341 = vrsqrt.f32 %v554_v21 }
 0x217   : > { %v1342_v22 = vpop.eup %1341 }
 0x218   : > { %v556_v24 = vmul.f32 %v1342_v22, %v548_v13 }
 0x21a   : > { %v563_v26 = vmul.f32 %v1126_v23, %v556_v24 }
 0x21c   : > { %v570_v27 = vadd.f32 %v1127_v25, %v563_v26 }
 0x21e   : > { %1203 = vmatmul.mubr.msk.f32.vlgmr.msra.gmra.mxu1 %vm542_vm2, %v570_v27 }
 0x21f   : > { %1206 = vmatpush3.msra.mxu1 %v653_v28  ;;  %1217 = vmatprep.mubr.msk.f32.mxu1 %vm1496_vm0, %v1495_v1 }
 0x220   : > { %1207 = vmatprep.subr.mxu1 %v1495_v1 }
 0x221   : > { %1208 = vmatpush3.msra.mxu1 %v652_v29 }
 0x222   : > { %1209 = vmatprep.subr.mxu1 %v1495_v1 }
 0x223   : > { %1210 = vmatpush3.msra.mxu1 %v651_v30 }
 0x224   : > { %1211 = vmatprep.subr.mxu1 %v1495_v1 }
 0x225   : > { %1212 = vmatpush3.msra.mxu1 %v650_v31 }
 0x226   : > { %1213 = vmatprep.subr.mxu1 %v1495_v1 }
 0x227   : > { %1214 = vmatpush3.msra.mxu1 %v649_v32 }
 0x228   : > { %1215 = vmatprep.subr.mxu1 %v1495_v1 }
 0x229   : > { %1216 = vmatpush3.msra.mxu1 %v648_v33 }
 0x22a   : > { %1218 = vmatmul.mubr.msk.f32.vlgmr.msra.gmra.mxu1 %vm466_vm1, %v459_v7  ;;  %1239 = vmatprep.subr.mxu1 %v1495_v1 }
 0x22b   : > { %1255 = vmatprep.mubr.msk.f32.mxu1 %vm1496_vm0, %v1495_v1  ;;  %1240 = vmatpush3.msra.mxu1 %v844_v45 }
 0x22c   : > { %1241 = vmatprep.subr.mxu1 %v1495_v1 }
 0x22d   : > { %1242 = vmatpush3.msra.mxu1 %v843_v47 }
 0x22e   : > { %1243 = vmatprep.subr.mxu1 %v1495_v1 }
 0x22f   : > { %1244 = vmatpush3.msra.mxu1 %v842_v49 }
 0x230   : > { %1245 = vmatprep.subr.mxu1 %v1495_v1 }
 0x231   : > { %1246 = vmatpush3.msra.mxu1 %v841_v51 }
 0x232   : > { %1247 = vmatprep.subr.mxu1 %v1495_v1 }
 0x233   : > { %1248 = vmatpush3.msra.mxu1 %v840_v53 }
 0x234   : > { %1249 = vmatprep.subr.mxu1 %v1495_v1 }
 0x235   : > { %1250 = vmatpush3.msra.mxu1 %v839_v55 }
 0x236   : > { %1251 = vmatprep.subr.mxu1 %v1495_v1 }
 0x237   : > { %1252 = vmatpush3.msra.mxu1 %v838_v57 }
 0x238   : > { %1253 = vmatprep.subr.mxu1 %v1495_v1  ;;  %v1131_v1 = vld [vmem:[%s1943_s9] ss:$0 sm:$0xff] }
 0x239   : > { %1254 = vmatpush3.msra.mxu1 %v837_v59 }
 0x2de   : > { %v643_v34 = vpop.f32.mrf.mxu1 }
 0x2df   : > { %647 = vst.msk [vmem:[%s436_s15] sm:$0xff] %vm466_vm1, %v643_v34 }
 0x2e0   : > { %v1204_v35 = vpop.f32.mrf.mxu1 }
 0x2ea   : > { %v720_v36 = vpop.f32.mrf.mxu1 }
 0x2eb   : > { %v727_v37 = vsel %vm726_vm3, %v720_v36, 0.0 }
 0x2ec   : > { %728 = vadd.xlane.f32.xlu1 %v727_v37  ;;  %v1219_v38 = vpop.f32.mrf.mxu1 }
 0x375   : > { %v729_v39 = vpop.xlane.xlu1 %728 }
 0x376   : > { %v731_v40 = vmul.f32 0.015625, %v729_v39 }
 0x378   : > { %v732_v41 = vsub.f32 %v720_v36, %v731_v40 }
 0x37a   : > { %v733_v42 = vmul.f32 %v732_v41, %v732_v41 }
 0x37c   : > { %v734_v43 = vsel %vm726_vm3, %v733_v42, 0.0 }
 0x37d   : > { %735 = vadd.xlane.f32.xlu1 %v734_v43 }
 0x406   : > { %v736_v60 = vpop.xlane.xlu1 %735 }
 0x407   : > { %v737_v61 = vmul.f32 0.015625, %v736_v60 }
 0x409   : > { %v738_v62 = vadd.f32 1e-05, %v737_v61 }
 0x40b   : > { %1343 = vrsqrt.f32 %v738_v62 }
 0x418   : > { %v1344_v63 = vpop.eup %1343 }
 0x419   : > { %v740_v2 = vmul.f32 %v1344_v63, %v732_v41 }
 0x41b   : > { %v747_v3 = vmul.f32 %v1130_v0, %v740_v2 }
 0x41d   : > { %v754_v4 = vadd.f32 %v1131_v1, %v747_v3 }
 0x41f   : > { %1237 = vmatmul.mubr.msk.f32.vlgmr.msra.gmra.mxu0 %vm726_vm3, %v754_v4  ;;  %1256 = vmatmul.mubr.msk.f32.vlgmr.msra.gmra.mxu1 %vm726_vm3, %v754_v4 }
 0x420   : > { %1358 = shalt.err (!%p1355_p7)
}
 0x421   : > { %s1359_s18 = scalar_lea.hbm %s940_s21, 128  ;;  %s1363_s30 = scalar_lea.hbm %s1944_s10, 512 }
 0x422   : > { %p1360_p9 = scmp.ne.s32.totalorder %s940_s21, %s1359_s18  ;;  %p1364_p12 = scmp.lt.s32.totalorder %s940_s21, %s1944_s10 }
 0x423   : > { %p1365_p13 = scmp.lt.s32.totalorder %s1363_s30, %s1359_s18 }
 0x424   : > { %p1361_p10 = pnand %p1360_p9, %p1618_p3 }
 0x425   : > { %p1366_p0 = por %p1365_p13, %p1364_p12 }
 0x426   : > { %p1362_p11 = pneg %p1361_p10 }
 0x428   : > { %p1367_p1 = pnand %p1366_p0, %p1362_p11 }
 0x42a   : > { %1370 = shalt.err (!%p1367_p1)
}
 0x42b   : > { %1258 = dma.vmem_to_hbm [thread:$0]  (%p1618_p3), %s943_s23, 128, %s940_s21, %s917_s27  }
 0x42c   : > { %s1966_s29 = sadd.s32 4294967295, %s1493_s28   ;;  %s443_s25 = scalar_lea.vmem [#allocation4], %s1733_s13 }
 0x42d   : > { %s1837_s17 = sand.u32 1, %s1966_s29   ;;  %s957_s24 = sshll.u32 %s443_s25, 4  ;;  %s1847_s24 = int_to_ptr.vmem [resolvable:$true] %s957_s24 }
 0x42e   : > { %s450_s20 = scalar_lea.vmem [#allocation6], %s1733_s13  ;;  %s1845_s19 = scalar_lea.hbm %s1945_s11, %s1813_s14 }
 0x42f   : > { %s972_s18 = sshll.u32 %s450_s20, 4  ;;  %s1855_s27 = scalar_lea.hbm %s1946_s12, %s1813_s14  ;;  %s1849_s18 = int_to_ptr.vmem [resolvable:$true] %s972_s18 }
 0x430   : > { %s922_s13 = scalar_lea.sflag [#allocation5], %s1837_s17  ;;  %s1371_s26 = scalar_lea.vmem %s1847_s24, 128 }
 0x431   : > { %p1372_p2 = scmp.ne.s32.totalorder %s1847_s24, %s1371_s26  ;;  %s1498_s29 = smov [#allocation4]  }
 0x432   : > { %s1375_s15 = sshll.u32 %s1498_s29, 4  ;;  %s1376_s15 = int_to_ptr.vmem [resolvable:$false] %s1375_s15 }
 0x433   : > { %p1373_p4 = pnand %p1372_p2, %p1618_p3  ;;  %s1377_s30 = scalar_lea.vmem %s1376_s15, 256 }
 0x434   : > { %p1378_p6 = scmp.lt.s32.totalorder %s1847_s24, %s1376_s15  ;;  %p1379_p7 = scmp.lt.s32.totalorder %s1377_s30, %s1371_s26 }
 0x435   : > { %p1374_p5 = pneg %p1373_p4 }
 0x436   : > { %p1380_p9 = por %p1379_p7, %p1378_p6 }
 0x438   : > { %p1381_p10 = pnand %p1380_p9, %p1374_p5 }
 0x4df   : > { %v832_v5 = vpop.f32.mrf.mxu0  ;;  %v911_v6 = vpop.f32.mrf.mxu1 }
 0x4e0   : > { %836 = vst.msk [vmem:[%s443_s25] sm:$0xff] %vm466_vm1, %v832_v5  ;;  %915 = vst.msk [vmem:[%s450_s20] sm:$0xff] %vm466_vm1, %v911_v6 }
 0x4e1   : > { %v1238_v7 = vpop.f32.mrf.mxu0  ;;  %v1257_v8 = vpop.f32.mrf.mxu1 }
 0x4e2   : > { %1384 = shalt.err (!%p1381_p10)
}
 0x4e3   : > { %s1385_s14 = scalar_lea.hbm %s1845_s19, 128  ;;  %s1389_s21 = scalar_lea.hbm %s1945_s11, 512 }
 0x4e4   : > { %p1386_p11 = scmp.ne.s32.totalorder %s1845_s19, %s1385_s14  ;;  %p1390_p0 = scmp.lt.s32.totalorder %s1845_s19, %s1945_s11 }
 0x4e5   : > { %p1391_p1 = scmp.lt.s32.totalorder %s1389_s21, %s1385_s14 }
 0x4e6   : > { %p1387_p12 = pnand %p1386_p11, %p1618_p3 }
 0x4e7   : > { %p1392_p2 = por %p1391_p1, %p1390_p0 }
 0x4e8   : > { %p1388_p13 = pneg %p1387_p12 }
 0x4ea   : > { %p1393_p4 = pnand %p1392_p2, %p1388_p13 }
 0x4ec   : > { %1396 = shalt.err (!%p1393_p4)
}
 0x4ed   : > { %1259 = dma.vmem_to_hbm [thread:$0]  (%p1618_p3), %s1847_s24, 128, %s1845_s19, %s922_s13  }
 0x4ee   : > { %s1397_s26 = scalar_lea.vmem %s1849_s18, 128  ;;  %s1499_s15 = smov [#allocation6]  }
 0x4ef   : > { %p1398_p5 = scmp.ne.s32.totalorder %s1849_s18, %s1397_s26  ;;  %s1401_s30 = sshll.u32 %s1499_s15, 4  ;;  %s1402_s30 = int_to_ptr.vmem [resolvable:$false] %s1401_s30 }
 0x4f0   : > { %s1403_s14 = scalar_lea.vmem %s1402_s30, 256  ;;  %p1404_p9 = scmp.lt.s32.totalorder %s1849_s18, %s1402_s30 }
 0x4f1   : > { %p1399_p6 = pnand %p1398_p5, %p1618_p3  ;;  %p1405_p10 = scmp.lt.s32.totalorder %s1403_s14, %s1397_s26 }
 0x4f3   : > { %p1400_p7 = pneg %p1399_p6  ;;  %p1406_p11 = por %p1405_p10, %p1404_p9 }
 0x4f5   : > { %p1407_p12 = pnand %p1406_p11, %p1400_p7 }
 0x4f7   : > { %1410 = shalt.err (!%p1407_p12)
}
 0x4f8   : > { %s1411_s25 = scalar_lea.hbm %s1855_s27, 128  ;;  %s1415_s20 = scalar_lea.hbm %s1946_s12, 512 }
 0x4f9   : > { %p1412_p13 = scmp.ne.s32.totalorder %s1855_s27, %s1411_s25  ;;  %p1416_p2 = scmp.lt.s32.totalorder %s1855_s27, %s1946_s12 }
 0x4fa   : > { %p1417_p4 = scmp.lt.s32.totalorder %s1415_s20, %s1411_s25 }
 0x4fb   : > { %p1413_p0 = pnand %p1412_p13, %p1618_p3 }
 0x4fc   : > { %p1418_p5 = por %p1417_p4, %p1416_p2 }
 0x4fd   : > { %p1414_p1 = pneg %p1413_p0 }
 0x4ff   : > { %p1419_p6 = pnand %p1418_p5, %p1414_p1 }
 0x501   : > { %1422 = shalt.err (!%p1419_p6)
}
 0x502   : > { %1260 = dma.vmem_to_hbm [thread:$0]  (%p1618_p3), %s1849_s18, 128, %s1855_s27, %s922_s13  }
 0x503 PF: > { %s1967_s29 = sld [smem:[#allocation9_spill]]  ;;  %p1274_p7 = scmp.ge.s32.totalorder %s1493_s28, 2 }
 0x505   : > { %p1265_p9 = pnand %p1274_p7, %p1629_p8 }
 0x507   : > { %p1266_p10 = pneg %p1265_p9 }
 0x509   : > { %s984_s15 = sand.u32 1, %s1967_s29  }
 0x50a   : > { %s985_s30 = scalar_lea.sflag [#allocation3], %s984_s15 }
 0x50b   : > { %1456 = dma.done.wait (%p1266_p10), %s985_s30, 128  }
 0x50c   : > { %1458 = vsyncadd (%p1266_p10), %s985_s30, 4294967168  ;;  %s1969_s14 = sadd.s32 4294967294, %s1493_s28  }
 0x50d   : > { %s993_s16 = sand.u32 1, %s1969_s14  }
 0x50e   : > { %s994_s25 = scalar_lea.sflag [#allocation5], %s993_s16 }
 0x50f   : > { %1460 = dma.done.wait (%p1266_p10), %s994_s25, 256  }
 0x510   : > { %1462 = vsyncadd (%p1266_p10), %s994_s25, 4294967040  ;;  %s29_s28 = sadd.s32 1, %s1493_s28   ;;  %s1970_s17 = sld [smem:[#allocation10_spill]] }
 0x511   : > { %p26_p3 = scmp.ge.s32.totalorder %s29_s28, 6   ;;  %s1971_s23 = sld [smem:[#allocation16_spill]] }
 0x512   : > { %s1972_s24 = sld [smem:[#allocation11_spill]]  ;;  %s1976_s21 = smov %s1469_s22 }
 0x513   : > { %s1973_s25 = sld [smem:[#allocation12_spill]]  ;;  %28 = sbr.rel (!%p26_p3) target bundleno = 7 (0x7), region = 127 }
 0x514   : > { %s1974_s26 = sld [smem:[#allocation13_spill]] }
 0x515   : > { %s1975_s27 = sld [smem:[#allocation14_spill]] }
 0x516   : > { %s1977_s22 = smov %s1970_s17 }
 0x518   :  { %1008 = vsyncpa [#allocation3], 1 }
 0x519   :  { %1010 = vsyncpa [#allocation3 + $0x1], 1 }
 0x51a   :  { %1011 = vsyncpa [#allocation5], 1 }
 0x51b   :  { %1013 = vsyncpa [#allocation5 + $0x1], 1 }

</bundles_post_ra>
